<compile_context>
chip_gen: v6e
topology: v6e:2x2x1
jax: 0.10.0
libtpu: 0.0.40
codegen_flags: <defaults>
</compile_context>

<pallas_src>
import jax
import jax.numpy as jnp
from jax import lax
from jax.experimental import pallas as pl
from jax.experimental.pallas import tpu as pltpu

KH = KW = 3  # synthetic backbone stem conv kernel size (padding=1, stride=1)


def fused_conv_pool_fc_kernel(p_ref, w_ref, b_ref, wc_ref, bc_ref,
                              feat_ref, logits_ref):
    """One batch element: im2col matmul + bias + ReLU, then pool + classify.

    p_ref     : (H*W, K)       im2col patches, compute dtype (f32 or bf16)
    w_ref     : (K, F)         conv weights (flattened HWIO), compute dtype
    b_ref     : (1, F)         conv bias, f32
    wc_ref    : (F, n_class)   classifier weights, compute dtype
    bc_ref    : (1, n_class)   classifier bias, f32
    feat_ref  : (H*W, F)       output feature map slab, f32
    logits_ref: (1, n_class)   output logits row, f32
    """
    hw = feat_ref.shape[0]

    # Single K=KH*KW*Cin contraction on the MXU, f32 accumulation.
    acc = jnp.dot(p_ref[...], w_ref[...], preferred_element_type=jnp.float32)

    # Epilogue in f32 on the VPU (v5e has no bf16 VALU/EUP).
    feat = jnp.maximum(acc + b_ref[...], 0.0)            # (H*W, F)
    feat_ref[...] = feat

    # Global average pool over H*W (row reduction) -> (1, F).
    pooled = jnp.sum(feat, axis=0, keepdims=True) * (1.0 / hw)

    # Linear classifier, f32 accumulation.
    logits_ref[...] = (
        jnp.dot(pooled.astype(wc_ref.dtype), wc_ref[...],
                preferred_element_type=jnp.float32)
        + bc_ref[...]
    )


def cassava_forward(x_nchw, params, *, compute_dtype=jnp.float32):
    """Pallas forward pass. x_nchw: (B, Cin, H, W) float32 (PyTorch layout)."""
    B, Cin, H, W = x_nchw.shape
    conv_w = params["conv_w"]   # (KH, KW, Cin, F)
    conv_b = params["conv_b"]   # (1, F)     f32
    fc_w = params["fc_w"]       # (F, n_class)
    fc_b = params["fc_b"]       # (1, n_class) f32
    F = conv_w.shape[-1]
    n_class = fc_w.shape[-1]
    K = KH * KW * Cin
    HW = H * W

    # --- layout plumbing in plain JAX (not compute) -------------------------
    # NCHW -> NHWC, 'SAME' zero pad, im2col to (B, H*W, KH*KW*Cin).
    x = jnp.transpose(x_nchw, (0, 2, 3, 1))
    xp = jnp.pad(x, ((0, 0), (1, 1), (1, 1), (0, 0)))
    patches = jnp.concatenate(
        [xp[:, kh:kh + H, kw:kw + W, :] for kh in range(KH) for kw in range(KW)],
        axis=-1,
    ).reshape(B, HW, K).astype(compute_dtype)
    w2d = conv_w.reshape(K, F).astype(compute_dtype)   # matches patch ordering
    wc = fc_w.astype(compute_dtype)

    # --- single fused kernel, gridded over batch ----------------------------
    feats_flat, logits3 = pl.pallas_call(
        fused_conv_pool_fc_kernel,
        out_shape=(
            jax.ShapeDtypeStruct((B, HW, F), jnp.float32),
            jax.ShapeDtypeStruct((B, 1, n_class), jnp.float32),
        ),
        grid=(B,),
        in_specs=[
            pl.BlockSpec((None, HW, K), lambda b: (b, 0, 0)),   # patches
            pl.BlockSpec((K, F), lambda b: (0, 0)),             # conv weights
            pl.BlockSpec((1, F), lambda b: (0, 0)),             # conv bias
            pl.BlockSpec((F, n_class), lambda b: (0, 0)),       # fc weights
            pl.BlockSpec((1, n_class), lambda b: (0, 0)),       # fc bias
        ],
        out_specs=(
            pl.BlockSpec((None, HW, F), lambda b: (b, 0, 0)),   # feats slab
            pl.BlockSpec((None, 1, n_class), lambda b: (b, 0, 0)),  # logits
        ),
        compiler_params=pltpu.CompilerParams(
            dimension_semantics=("parallel",)),
    )(patches, w2d, conv_b, wc, fc_b)

    logits = logits3[:, 0, :]
    # Return feats in PyTorch NCHW convention, like the module does.
    feats_nchw = jnp.transpose(feats_flat.reshape(B, H, W, F), (0, 3, 1, 2))
    return logits, feats_nchw


def reference_forward(x_nchw, params):
    """Pure-JAX reference for correctness checking."""
    x = jnp.transpose(x_nchw, (0, 2, 3, 1))
    feats = lax.conv_general_dilated(
        x, params["conv_w"], window_strides=(1, 1), padding="SAME",
        dimension_numbers=("NHWC", "HWIO", "NHWC"))
    feats = jnp.maximum(feats + params["conv_b"][0], 0.0)
    pooled = jnp.mean(feats, axis=(1, 2))
    logits = pooled @ params["fc_w"] + params["fc_b"][0]
    return logits, jnp.transpose(feats, (0, 3, 1, 2))


if __name__ == "__main__":
    # Small, deterministic shapes consistent with the module's forward:
    # RGB image batch, synthetic backbone width F, n_class = 5 (cassava).
    B, Cin, H, W = 2, 3, 16, 16
    F, n_class = 32, 5

    key = jax.random.PRNGKey(0)
    kx, k1, k2, k3, k4 = jax.random.split(key, 5)
    x = jax.random.normal(kx, (B, Cin, H, W), jnp.float32)
    params = {
        "conv_w": 0.1 * jax.random.normal(k1, (KH, KW, Cin, F), jnp.float32),
        "conv_b": 0.1 * jax.random.normal(k2, (1, F), jnp.float32),
        "fc_w": 0.1 * jax.random.normal(k3, (F, n_class), jnp.float32),
        "fc_b": 0.1 * jax.random.normal(k4, (1, n_class), jnp.float32),
    }

    ref_logits, ref_feats = reference_forward(x, params)

    # f32 MXU-operand path: tight check.
    logits, feats = cassava_forward(x, params, compute_dtype=jnp.float32)
    jax.block_until_ready(logits)
    jax.block_until_ready(feats)
    assert logits.shape == (B, n_class) and feats.shape == (B, F, H, W)
    assert jnp.allclose(logits, ref_logits, atol=1e-4, rtol=1e-4)
    assert jnp.allclose(feats, ref_feats, atol=1e-4, rtol=1e-4)

    # bf16 MXU-operand path (v6e/v7x fast path, f32 accumulate): loose check.
    logits_bf, feats_bf = cassava_forward(x, params, compute_dtype=jnp.bfloat16)
    jax.block_until_ready(logits_bf)
    jax.block_until_ready(feats_bf)
    assert jnp.allclose(logits_bf, ref_logits, atol=1e-1, rtol=1e-1)
    assert jnp.allclose(feats_bf, ref_feats, atol=1e-1, rtol=1e-1)

    print("KERNEL_OK")
</pallas_src>

<mosaic_0001>
module attributes {stable_mosaic.version = 11 : i64} {
  func.func @fused_conv_pool_fc_kernel(%arg0: i32, %arg1: memref<1x256x27xf32, #tpu.memory_space<vmem>>, %arg2: memref<27x32xf32, #tpu.memory_space<vmem>>, %arg3: memref<1x32xf32, #tpu.memory_space<vmem>>, %arg4: memref<32x5xf32, #tpu.memory_space<vmem>>, %arg5: memref<1x5xf32, #tpu.memory_space<vmem>>, %arg6: memref<1x256x32xf32, #tpu.memory_space<vmem>>, %arg7: memref<1x1x5xf32, #tpu.memory_space<vmem>>) attributes {dimension_semantics = [#tpu.dimension_semantics<parallel>], iteration_bounds = array<i64: 2>, scalar_prefetch = 0 : i64, scratch_operands = 0 : i64, tpu.core_type = #tpu.core_type<tc>, window_params = [{transform_indices = @transform_0, window_bounds = array<i64: 1, 256, 27>}, {pipeline_mode = #tpu.pipeline_mode<synchronous>, transform_indices = @transform_1, window_bounds = array<i64: 27, 32>}, {pipeline_mode = #tpu.pipeline_mode<synchronous>, transform_indices = @transform_2, window_bounds = array<i64: 1, 32>}, {pipeline_mode = #tpu.pipeline_mode<synchronous>, transform_indices = @transform_3, window_bounds = array<i64: 32, 5>}, {pipeline_mode = #tpu.pipeline_mode<synchronous>, transform_indices = @transform_4, window_bounds = array<i64: 1, 5>}, {transform_indices = @transform_5, window_bounds = array<i64: 1, 256, 32>}, {transform_indices = @transform_6, window_bounds = array<i64: 1, 1, 5>}]} {
    %c0 = arith.constant 0 : index
    %c0_0 = arith.constant 0 : index
    %c0_1 = arith.constant 0 : index
    %0 = vector.load %arg1[%c0, %c0_0, %c0_1] : memref<1x256x27xf32, #tpu.memory_space<vmem>>, vector<1x256x27xf32>
    %1 = vector.shape_cast %0 : vector<1x256x27xf32> to vector<256x27xf32>
    %c0_2 = arith.constant 0 : index
    %c0_3 = arith.constant 0 : index
    %2 = vector.load %arg2[%c0_2, %c0_3] : memref<27x32xf32, #tpu.memory_space<vmem>>, vector<27x32xf32>
    %cst = arith.constant dense<0.000000e+00> : vector<256x32xf32>
    %3 = tpu.matmul %1, %2, %cst {dimension_numbers = #tpu.dot_dimension_numbers<[1], [0], [0], [1], [0, 0, 1, 1], [], []>} : vector<256x27xf32>, vector<27x32xf32>, vector<256x32xf32> -> vector<256x32xf32>
    %c0_4 = arith.constant 0 : index
    %c0_5 = arith.constant 0 : index
    %4 = vector.load %arg3[%c0_4, %c0_5] : memref<1x32xf32, #tpu.memory_space<vmem>>, vector<1x32xf32>
    %5 = vector.broadcast %4 : vector<1x32xf32> to vector<256x32xf32>
    %6 = arith.addf %3, %5 : vector<256x32xf32>
    %cst_6 = arith.constant 0.000000e+00 : f32
    %7 = vector.broadcast %cst_6 : f32 to vector<256x32xf32>
    %8 = arith.maximumf %6, %7 : vector<256x32xf32>
    %c0_7 = arith.constant 0 : index
    %c0_8 = arith.constant 0 : index
    %c0_9 = arith.constant 0 : index
    %9 = vector.load %arg6[%c0_7, %c0_8, %c0_9] : memref<1x256x32xf32, #tpu.memory_space<vmem>>, vector<1x256x32xf32>
    %10 = vector.shape_cast %9 : vector<1x256x32xf32> to vector<256x32xf32>
    %11 = vector.shape_cast %8 : vector<256x32xf32> to vector<1x256x32xf32>
    tpu.vector_store %arg6[%c0_7, %c0_8, %c0_9], %11 {strides = array<i32>} : memref<1x256x32xf32, #tpu.memory_space<vmem>>, vector<1x256x32xf32>,
    %cst_10 = arith.constant dense<0.000000e+00> : vector<32xf32>
    %12 = vector.multi_reduction <add>, %8, %cst_10 [0] : vector<256x32xf32> to vector<32xf32>
    %13 = vector.shape_cast %12 : vector<32xf32> to vector<1x32xf32>
    %cst_11 = arith.constant 3.906250e-03 : f32
    %14 = vector.broadcast %cst_11 : f32 to vector<1x32xf32>
    %15 = arith.mulf %13, %14 : vector<1x32xf32>
    %c0_12 = arith.constant 0 : index
    %c0_13 = arith.constant 0 : index
    %16 = vector.load %arg4[%c0_12, %c0_13] : memref<32x5xf32, #tpu.memory_space<vmem>>, vector<32x5xf32>
    %cst_14 = arith.constant dense<0.000000e+00> : vector<1x5xf32>
    %17 = tpu.matmul %15, %16, %cst_14 {dimension_numbers = #tpu.dot_dimension_numbers<[1], [0], [0], [1], [0, 0, 1, 1], [], []>} : vector<1x32xf32>, vector<32x5xf32>, vector<1x5xf32> -> vector<1x5xf32>
    %c0_15 = arith.constant 0 : index
    %c0_16 = arith.constant 0 : index
    %18 = vector.load %arg5[%c0_15, %c0_16] : memref<1x5xf32, #tpu.memory_space<vmem>>, vector<1x5xf32>
    %19 = arith.addf %17, %18 : vector<1x5xf32>
    %c0_17 = arith.constant 0 : index
    %c0_18 = arith.constant 0 : index
    %c0_19 = arith.constant 0 : index
    %20 = vector.load %arg7[%c0_17, %c0_18, %c0_19] : memref<1x1x5xf32, #tpu.memory_space<vmem>>, vector<1x1x5xf32>
    %21 = vector.shape_cast %20 : vector<1x1x5xf32> to vector<1x5xf32>
    %22 = vector.shape_cast %19 : vector<1x5xf32> to vector<1x1x5xf32>
    tpu.vector_store %arg7[%c0_17, %c0_18, %c0_19], %22 {strides = array<i32>} : memref<1x1x5xf32, #tpu.memory_space<vmem>>, vector<1x1x5xf32>,
    return
  }
  func.func @transform_0(%arg0: i32) -> (i32, i32, i32) {
    %c0_i32 = arith.constant 0 : i32
    %c0_i32_0 = arith.constant 0 : i32
    %c0_i32_1 = arith.constant 0 : i32
    return %arg0, %c0_i32, %c0_i32_0 : i32, i32, i32
  }
  func.func @transform_1(%arg0: i32) -> (i32, i32) {
    %c0_i32 = arith.constant 0 : i32
    %c0_i32_0 = arith.constant 0 : i32
    %c0_i32_1 = arith.constant 0 : i32
    return %c0_i32, %c0_i32_0 : i32, i32
  }
  func.func @transform_2(%arg0: i32) -> (i32, i32) {
    %c0_i32 = arith.constant 0 : i32
    %c0_i32_0 = arith.constant 0 : i32
    %c0_i32_1 = arith.constant 0 : i32
    return %c0_i32, %c0_i32_0 : i32, i32
  }
  func.func @transform_3(%arg0: i32) -> (i32, i32) {
    %c0_i32 = arith.constant 0 : i32
    %c0_i32_0 = arith.constant 0 : i32
    %c0_i32_1 = arith.constant 0 : i32
    return %c0_i32, %c0_i32_0 : i32, i32
  }
  func.func @transform_4(%arg0: i32) -> (i32, i32) {
    %c0_i32 = arith.constant 0 : i32
    %c0_i32_0 = arith.constant 0 : i32
    %c0_i32_1 = arith.constant 0 : i32
    return %c0_i32, %c0_i32_0 : i32, i32
  }
  func.func @transform_5(%arg0: i32) -> (i32, i32, i32) {
    %c0_i32 = arith.constant 0 : i32
    %c0_i32_0 = arith.constant 0 : i32
    %c0_i32_1 = arith.constant 0 : i32
    return %arg0, %c0_i32, %c0_i32_0 : i32, i32, i32
  }
  func.func @transform_6(%arg0: i32) -> (i32, i32, i32) {
    %c0_i32 = arith.constant 0 : i32
    %c0_i32_0 = arith.constant 0 : i32
    %c0_i32_1 = arith.constant 0 : i32
    return %arg0, %c0_i32, %c0_i32_0 : i32, i32, i32
  }
}

</mosaic_0001>

<bundles_post_ra>
// kernel: tpu_custom_call.1
= control target key start
LH: loop header
LB: loop body
LE: loop exit
PB: predicated region body
PF: predicated region fallthrough
CT: control target
= control target key end

     0   :  { %12 = vsyncpa [#allocation3], 0  ;;  %s1664_s0 = inlined_call_operand.vmem [shape: f32[2,256,27], index: 0, kind: input, shape index: {}]   ;;  %s1665_s1 = inlined_call_operand.vmem [shape: f32[27,32], index: 1, kind: input, shape index: {}]   ;;  %s1666_s2 = inlined_call_operand.vmem [shape: f32[1,32], index: 2, kind: input, shape index: {}]   ;;  %s1667_s3 = inlined_call_operand.vmem [shape: f32[32,5], index: 3, kind: input, shape index: {}]   ;;  %s1668_s4 = inlined_call_operand.vmem [shape: f32[1,5], index: 4, kind: input, shape index: {}]   ;;  %s1669_s5 = inlined_call_operand.vmem [shape: f32[2,256,32], index: 5, kind: output, shape index: {0}]   ;;  %s1670_s6 = inlined_call_operand.hbm [shape: f32[2,1,5], index: 6, kind: output, shape index: {1}]  }
   0x1   :  { %14 = vsyncpa [#allocation3 + $0x1], 0  ;;  %s1252_s21 = smov 0   ;;  %s1254_s22 = smov 0  }
   0x2   :  { %s1256_s23 = smov 0   ;;  %s1258_s24 = smov 0  }
   0x3 LB: > { %s1273_s25 = sadd.s32 4294967295, %s1212_s24   ;;  %s947_s26 = sadd.s32 4294967294, %s1212_s24   ;;  %s1212_s24 = sphi %s1258_s24, %s1676_s24   ;;  %s1208_s23 = sphi %s1256_s23, %s1675_s23   ;;  %s1204_s22 = sphi %s1254_s22, %s1674_s22   ;;  %s1200_s21 = sphi %s1252_s21, %s1673_s21  }
   0x4   : > { %s1277_s27 = sadd.s32 1, %s1212_s24   ;;  %s163_s28 = sadd.s32 1, %s1208_s23 }
   0x5   : > { %s160_s29 = ssub.s32 %s1212_s24, %s1277_s27  ;;  %p173_p0 = scmp.ne.s32.totalorder %s1208_s23, %s1204_s22 }
   0x6   : > { %p161_p1 = scmp.eq.s32.totalorder %s160_s29, 0  ;;  %p174_p2 = scmp.eq.s32.totalorder %s1273_s25, 1 }
   0x7   : > { %p179_p3 = scmp.ne.s32.totalorder %s1204_s22, %s1200_s21  ;;  %p180_p4 = scmp.eq.s32.totalorder %s947_s26, 1 }
   0x8   : > { %s1288_s30 = scalar_select %p161_p1, %s1208_s23, %s163_s28  }
   0x9   : > { %p1290_p5 = por %p174_p2, %p173_p0  ;;  %p1294_p6 = por %p180_p4, %p179_p3 }
   0xa   : > { %p950_p7 = scmp.ge.s32.totalorder %s1212_s24, 1  ;;  %p218_p8 = scmp.lt.s32.totalorder %s1212_s24, 3 }
   0xc   : > { %p219_p9 = pnand %p950_p7, %p218_p8 }
   0xd   : > { %p252_p10 = scmp.lt.s32.totalorder (!%p219_p9), %s1273_s25, 1  ;;  %s990_s29 = sshll.u32 (!%p219_p9), %s1273_s25, 4 }
   0xe   : > { %222 = sbr.rel (%p219_p9) target bundleno = 514 (0x202), region = 40  ;;  %s1629_s13 = scalar_lea.hbm (!%p219_p9), %s1670_s6, %s990_s29 }
  0x13   : > { %v297_v0 = vld [vmem:[%s1665_s1 + $0x18] sm:$0x7]  ;;  %vm402_vm0 = vcmask 1042432   ;;  %v296_v1 = vld [vmem:[%s1665_s1 + $0x10] sm:$0xff]  ;;  %v295_v2 = vld [vmem:[%s1665_s1 + $0x8] sm:$0xff]  ;;  %s1311_s15 = scalar_select %p252_p10, %s1273_s25, 1 }
  0x14   : > { %1036 = vmatprep.subr.msk.mxu0 %vm402_vm0, %v297_v0  ;;  %1103 = vmatprep.subr.msk.mxu1 %vm402_vm0, %v297_v0  ;;  %v294_v3 = vld [vmem:[%s1665_s1] sm:$0xff]  ;;  %vm305_vm1 = vcmask 220160   ;;  %v769_v36 = vld [vmem:[%s1667_s3 + $0x18] sm:$0xff]  ;;  %v1214_v37 = vmov 0.0   ;;  %v768_v38 = vld [vmem:[%s1667_s3 + $0x10] sm:$0xff]  ;;  %vm1215_vm2 = vmmov 0  }
  0x15   : > { %1037 = vmatpush3.msk.msra.mxu0 %vm402_vm0, %v297_v0  ;;  %1107 = vmatpush3.msk.msra.mxu1 %vm402_vm0, %v297_v0  ;;  %s993_s18 = sshll.u32 %s1311_s15, 8  ;;  %v767_v39 = vld [vmem:[%s1667_s3 + $0x8] sm:$0xff]  ;;  %v766_v40 = vld [vmem:[%s1667_s3] sm:$0xff]  ;;  %vm663_vm3 = vcmask 261120   ;;  %s250_s15 = sand.u32 1, %s1204_s22   ;;  %vm844_vm4 = vcmask 32768  }
  0x16   : > { %1038 = vmatprep.subr.mxu0 %v296_v1  ;;  %1104 = vmatprep.subr.mxu1 %v296_v1  ;;  %s1322_s26 = scalar_lea.vmem %s1664_s0, %s993_s18  ;;  %v1403_v41 = vld [vmem:[%s1666_s2] ss:$0 sm:$0xff]  ;;  %s251_s9 = scalar_lea.vmem [#allocation2], %s250_s15 }
  0x17   : > { %1039 = vmatpush3.msra.mxu0 %v296_v1  ;;  %1108 = vmatpush3.msra.mxu1 %v296_v1  ;;  %v262_v4 = vld [vmem:[%s1322_s26] sm:$0xff]  ;;  %v263_v5 = vld [vmem:[%s1322_s26 + $0x8] sm:$0xff]  ;;  %v264_v6 = vld [vmem:[%s1322_s26 + $0x10] sm:$0xff]  ;;  %s867_s10 = sshll.u32 %s251_s9, 4  ;;  %s852_s14 = scalar_lea.sflag [#allocation3], %s250_s15  ;;  %s868_s10 = int_to_ptr.vmem [resolvable:$true] %s867_s10 }
  0x18   : > { %1040 = vmatprep.subr.mxu0 %v295_v2  ;;  %1105 = vmatprep.subr.mxu1 %v295_v2  ;;  %v265_v7 = vld [vmem:[%s1322_s26 + $0x18] sm:$0xff]  ;;  %v266_v8 = vld [vmem:[%s1322_s26 + $0x20] sm:$0xff]  ;;  %v280_v9 = vld [vmem:[%s1322_s26 + $0x90] sm:$0xff]  ;;  %s1152_s16 = scalar_lea.vmem %s868_s10, 16  ;;  %s1216_s25 = smov [#allocation2]  }
  0x19   : > { %1041 = vmatpush3.msra.mxu0 %v295_v2  ;;  %1109 = vmatpush3.msra.mxu1 %v295_v2  ;;  %v281_v10 = vld [vmem:[%s1322_s26 + $0x98] sm:$0xff]  ;;  %v282_v11 = vld [vmem:[%s1322_s26 + $0xa0] sm:$0xff]  ;;  %v267_v12 = vld [vmem:[%s1322_s26 + $0x28] sm:$0xff]  ;;  %p1153_p11 = scmp.ne.s32.totalorder %s868_s10, %s1152_s16  ;;  %s1156_s17 = sshll.u32 %s1216_s25, 4  ;;  %s1157_s17 = int_to_ptr.vmem [resolvable:$false] %s1156_s17 }
  0x1a   : > { %1042 = vmatprep.subr.mxu0 %v294_v3  ;;  %1044 = vmatprep.mubr.msk.f32.mxu0 %vm305_vm1, %v262_v4  ;;  %v268_v13 = vld [vmem:[%s1322_s26 + $0x30] sm:$0xff]  ;;  %v283_v14 = vld [vmem:[%s1322_s26 + $0xa8] sm:$0xff]  ;;  %v269_v16 = vld [vmem:[%s1322_s26 + $0x38] sm:$0xff]  ;;  %s1158_s19 = scalar_lea.vmem %s1157_s17, 32  ;;  %p1159_p0 = scmp.lt.s32.totalorder %s868_s10, %s1157_s17 }
  0x1b   : > { %1043 = vmatpush3.msra.mxu0 %v294_v3  ;;  %1106 = vmatprep.subr.mxu1 %v294_v3  ;;  %v284_v15 = vld [vmem:[%s1322_s26 + $0xb0] sm:$0xff]  ;;  %v270_v17 = vld [vmem:[%s1322_s26 + $0x40] sm:$0xff]  ;;  %v285_v18 = vld [vmem:[%s1322_s26 + $0xb8] sm:$0xff]  ;;  %p1154_p12 = pnand %p1153_p11, %p1290_p5  ;;  %p1160_p1 = scmp.lt.s32.totalorder %s1158_s19, %s1152_s16 }
  0x1c   : > { %1045 = vmatmul.mubr.msk.f32.vlgmr.msra.gmra.mxu0 %vm305_vm1, %v263_v5  ;;  %1110 = vmatpush3.msra.mxu1 %v294_v3  ;;  %v286_v19 = vld [vmem:[%s1322_s26 + $0xc0] sm:$0xff]  ;;  %v271_v20 = vld [vmem:[%s1322_s26 + $0x48] sm:$0xff]  ;;  %v272_v21 = vld [vmem:[%s1322_s26 + $0x50] sm:$0xff] }
  0x1d   : > { %1047 = vmatprep.mubr.msk.f32.mxu0 %vm305_vm1, %v264_v6  ;;  %1071 = vmatprep.mubr.msk.f32.mxu1 %vm305_vm1, %v280_v9  ;;  %v287_v22 = vld [vmem:[%s1322_s26 + $0xc8] sm:$0xff]  ;;  %v288_v23 = vld [vmem:[%s1322_s26 + $0xd0] sm:$0xff]  ;;  %v273_v24 = vld [vmem:[%s1322_s26 + $0x58] sm:$0xff]  ;;  %p1155_p13 = pneg %p1154_p12  ;;  %p1161_p2 = por %p1160_p1, %p1159_p0 }
  0x1e   : > { %1072 = vmatmul.mubr.msk.f32.vlgmr.msra.gmra.mxu1 %vm305_vm1, %v281_v10  ;;  %v274_v25 = vld [vmem:[%s1322_s26 + $0x60] sm:$0xff]  ;;  %v289_v26 = vld [vmem:[%s1322_s26 + $0xd8] sm:$0xff]  ;;  %v275_v28 = vld [vmem:[%s1322_s26 + $0x68] sm:$0xff]  ;;  %1092 = vmatprep.subr.mxu1 %v1214_v37 }
  0x1f   : > { %1074 = vmatprep.mubr.msk.f32.mxu1 %vm305_vm1, %v282_v11  ;;  %v290_v27 = vld [vmem:[%s1322_s26 + $0xe0] sm:$0xff]  ;;  %v276_v29 = vld [vmem:[%s1322_s26 + $0x70] sm:$0xff]  ;;  %v291_v30 = vld [vmem:[%s1322_s26 + $0xe8] sm:$0xff]  ;;  %1093 = vmatpush3.msra.mxu1 %v769_v36  ;;  %p1162_p3 = pnand %p1161_p2, %p1155_p13 }
  0x20   : > { %1048 = vmatmul.mubr.msk.f32.gmra.mxu0 %vm305_vm1, %v265_v7  ;;  %v292_v31 = vld [vmem:[%s1322_s26 + $0xf0] sm:$0xff]  ;;  %v277_v32 = vld [vmem:[%s1322_s26 + $0x78] sm:$0xff]  ;;  %v278_v33 = vld [vmem:[%s1322_s26 + $0x80] sm:$0xff]  ;;  %1094 = vmatprep.subr.mxu1 %v1214_v37 }
  0x21   : > { %1050 = vmatprep.mubr.msk.f32.mxu0 %vm305_vm1, %v266_v8  ;;  %v293_v34 = vld [vmem:[%s1322_s26 + $0xf8] sm:$0xff]  ;;  %v279_v35 = vld [vmem:[%s1322_s26 + $0x88] sm:$0xff]  ;;  %1095 = vmatpush3.msra.mxu1 %v768_v38  ;;  %s1411_s26 = scalar_lea.vmem %s1669_s5, %s993_s18 }
  0x22   : > { %1075 = vmatmul.mubr.msk.f32.gmra.mxu1 %vm305_vm1, %v283_v14  ;;  %1096 = vmatprep.subr.mxu1 %v1214_v37 }
  0x23   : > { %1077 = vmatprep.mubr.msk.f32.mxu1 %vm305_vm1, %v284_v15  ;;  %1097 = vmatpush3.msra.mxu1 %v767_v39 }
  0x24   : > { %1051 = vmatmul.mubr.msk.f32.gmra.mxu0 %vm305_vm1, %v267_v12  ;;  %1098 = vmatprep.subr.mxu1 %v1214_v37 }
  0x25   : > { %1053 = vmatprep.mubr.msk.f32.mxu0 %vm305_vm1, %v268_v13  ;;  %1099 = vmatpush3.msra.mxu1 %v766_v40 }
  0x26   : > { %1078 = vmatmul.mubr.msk.f32.gmra.mxu1 %vm305_vm1, %v285_v18 }
  0x27   : > { %1080 = vmatprep.mubr.msk.f32.mxu1 %vm305_vm1, %v286_v19 }
  0x28   : > { %1054 = vmatmul.mubr.msk.f32.gmra.mxu0 %vm305_vm1, %v269_v16 }
  0x29   : > { %1056 = vmatprep.mubr.msk.f32.mxu0 %vm305_vm1, %v270_v17 }
  0x2a   : > { %1081 = vmatmul.mubr.msk.f32.gmra.mxu1 %vm305_vm1, %v287_v22 }
  0x2b   : > { %1083 = vmatprep.mubr.msk.f32.mxu1 %vm305_vm1, %v288_v23 }
  0x2c   : > { %1057 = vmatmul.mubr.msk.f32.gmra.mxu0 %vm305_vm1, %v271_v20 }
  0x2d   : > { %1059 = vmatprep.mubr.msk.f32.mxu0 %vm305_vm1, %v272_v21 }
  0x2e   : > { %1084 = vmatmul.mubr.msk.f32.gmra.mxu1 %vm305_vm1, %v289_v26 }
  0x2f   : > { %1086 = vmatprep.mubr.msk.f32.mxu1 %vm305_vm1, %v290_v27 }
  0x30   : > { %1060 = vmatmul.mubr.msk.f32.gmra.mxu0 %vm305_vm1, %v273_v24 }
  0x31   : > { %1062 = vmatprep.mubr.msk.f32.mxu0 %vm305_vm1, %v274_v25 }
  0x32   : > { %1087 = vmatmul.mubr.msk.f32.gmra.mxu1 %vm305_vm1, %v291_v30 }
  0x33   : > { %1089 = vmatprep.mubr.msk.f32.mxu1 %vm305_vm1, %v292_v31 }
  0x34   : > { %1063 = vmatmul.mubr.msk.f32.gmra.mxu0 %vm305_vm1, %v275_v28 }
  0x35   : > { %1065 = vmatprep.mubr.msk.f32.mxu0 %vm305_vm1, %v276_v29 }
  0x36   : > { %1090 = vmatmul.mubr.msk.f32.gmra.mxu1 %vm305_vm1, %v293_v34 }
  0x37   : > { %1100 = vmatprep.mubr.msk.f32.mxu1 %vm1215_vm2, %v1214_v37 }
  0x38   : > { %1066 = vmatmul.mubr.msk.f32.gmra.mxu0 %vm305_vm1, %v277_v32 }
  0x39   : > { %1068 = vmatprep.mubr.msk.f32.mxu0 %vm305_vm1, %v278_v33 }
  0x3c   : > { %1069 = vmatmul.mubr.msk.f32.gmra.mxu0 %vm305_vm1, %v279_v35 }
  0xdc   : > { %v1046_v42 = vpop.f32.mrf.mxu0 }
  0xdd   : > { %v478_v43 = vadd.f32 %v1046_v42, %v1403_v41 }
  0xde   : > { %v472_v44 = vpop.f32.mrf.mxu0  ;;  %v1073_v50 = vpop.f32.mrf.mxu1 }
  0xdf   : > { %v632_v45 = vmax.f32 %v478_v43, 0.0  ;;  %v473_v46 = vadd.f32 %v1403_v41, %v472_v44  ;;  %v1418_v52 = vadd.f32 %v1073_v50, %v1403_v41 }
  0xe0   : > { %v1049_v47 = vpop.f32.mrf.mxu0  ;;  %v562_v56 = vpop.f32.mrf.mxu1 }
  0xe1   : > { %665 = vst.msk [vmem:[%s1411_s26 + $0x8] sm:$0xff] %vm663_vm3, %v632_v45  ;;  %v631_v48 = vmax.f32 %v473_v46, 0.0  ;;  %v488_v49 = vadd.f32 %v1049_v47, %v1403_v41  ;;  %v650_v58 = vmax.f32 %v1418_v52, 0.0  ;;  %v1426_v59 = vadd.f32 %v1403_v41, %v562_v56 }
  0xe2   : > { %v482_v51 = vpop.f32.mrf.mxu0  ;;  %v697_v60 = vsel %vm663_vm3, %v632_v45, 0.0  ;;  %v1076_v63 = vpop.f32.mrf.mxu1 }
  0xe3   : > { %664 = vst.msk [vmem:[%s1411_s26] sm:$0xff] %vm663_vm3, %v631_v48  ;;  %v696_v53 = vsel %vm663_vm3, %v631_v48, 0.0  ;;  %v634_v54 = vmax.f32 %v488_v49, 0.0  ;;  %v483_v55 = vadd.f32 %v1403_v41, %v482_v51  ;;  %683 = vst.msk [vmem:[%s1411_s26 + $0x98] sm:$0xff] %vm663_vm3, %v650_v58  ;;  %v649_v2 = vmax.f32 %v1426_v59, 0.0 }
  0xe4   : > { %v1052_v57 = vpop.f32.mrf.mxu0  ;;  %v698_v0 = vadd.f32 %v697_v60, %v696_v53  ;;  %v1438_v3 = vadd.f32 %v1076_v63, %v1403_v41  ;;  %v572_v7 = vpop.f32.mrf.mxu1 }
  0xe5   : > { %667 = vst.msk [vmem:[%s1411_s26 + $0x18] sm:$0xff] %vm663_vm3, %v634_v54  ;;  %v633_v61 = vmax.f32 %v483_v55, 0.0  ;;  %v498_v62 = vadd.f32 %v1052_v57, %v1403_v41  ;;  %682 = vst.msk [vmem:[%s1411_s26 + $0x90] sm:$0xff] %vm663_vm3, %v649_v2  ;;  %v1450_v11 = vadd.f32 %v1403_v41, %v572_v7  ;;  %v701_v12 = vsel %vm663_vm3, %v634_v54, 0.0 }
  0xe6   : > { %v492_v1 = vpop.f32.mrf.mxu0  ;;  %v652_v10 = vmax.f32 %v1438_v3, 0.0  ;;  %v1079_v15 = vpop.f32.mrf.mxu1 }
  0xe7   : > { %666 = vst.msk [vmem:[%s1411_s26 + $0x10] sm:$0xff] %vm663_vm3, %v633_v61  ;;  %v699_v4 = vsel %vm663_vm3, %v633_v61, 0.0  ;;  %v636_v5 = vmax.f32 %v498_v62, 0.0  ;;  %v493_v6 = vadd.f32 %v1403_v41, %v492_v1  ;;  %v651_v18 = vmax.f32 %v1450_v11, 0.0 }
  0xe8   : > { %v700_v8 = vadd.f32 %v699_v4, %v698_v0  ;;  %v1055_v9 = vpop.f32.mrf.mxu0  ;;  %685 = vst.msk [vmem:[%s1411_s26 + $0xa8] sm:$0xff] %vm663_vm3, %v652_v10  ;;  %v1462_v19 = vadd.f32 %v1079_v15, %v1403_v41  ;;  %v582_v23 = vpop.f32.mrf.mxu1 }
  0xe9   : > { %669 = vst.msk [vmem:[%s1411_s26 + $0x28] sm:$0xff] %vm663_vm3, %v636_v5  ;;  %v635_v13 = vmax.f32 %v493_v6, 0.0  ;;  %v508_v14 = vadd.f32 %v1055_v9, %v1403_v41  ;;  %684 = vst.msk [vmem:[%s1411_s26 + $0xa0] sm:$0xff] %vm663_vm3, %v651_v18  ;;  %v1474_v27 = vadd.f32 %v1403_v41, %v582_v23  ;;  %v705_v28 = vsel %vm663_vm3, %v636_v5, 0.0 }
  0xea   : > { %v702_v16 = vadd.f32 %v701_v12, %v700_v8  ;;  %v502_v17 = vpop.f32.mrf.mxu0  ;;  %v654_v26 = vmax.f32 %v1462_v19, 0.0  ;;  %v1082_v31 = vpop.f32.mrf.mxu1 }
  0xeb   : > { %668 = vst.msk [vmem:[%s1411_s26 + $0x20] sm:$0xff] %vm663_vm3, %v635_v13  ;;  %v703_v20 = vsel %vm663_vm3, %v635_v13, 0.0  ;;  %v638_v21 = vmax.f32 %v508_v14, 0.0  ;;  %v503_v22 = vadd.f32 %v1403_v41, %v502_v17  ;;  %v653_v34 = vmax.f32 %v1474_v27, 0.0 }
  0xec   : > { %v704_v24 = vadd.f32 %v703_v20, %v702_v16  ;;  %v1058_v25 = vpop.f32.mrf.mxu0  ;;  %687 = vst.msk [vmem:[%s1411_s26 + $0xb8] sm:$0xff] %vm663_vm3, %v654_v26  ;;  %v1486_v35 = vadd.f32 %v1082_v31, %v1403_v41  ;;  %v592_v39 = vpop.f32.mrf.mxu1  ;;  %v741_v52 = vsel %vm663_vm3, %v654_v26, 0.0 }
  0xed   : > { %671 = vst.msk [vmem:[%s1411_s26 + $0x38] sm:$0xff] %vm663_vm3, %v638_v21  ;;  %v637_v29 = vmax.f32 %v503_v22, 0.0  ;;  %v518_v30 = vadd.f32 %v1058_v25, %v1403_v41  ;;  %686 = vst.msk [vmem:[%s1411_s26 + $0xb0] sm:$0xff] %vm663_vm3, %v653_v34  ;;  %v1498_v44 = vadd.f32 %v1403_v41, %v592_v39  ;;  %v709_v45 = vsel %vm663_vm3, %v638_v21, 0.0 }
  0xee   : > { %v706_v32 = vadd.f32 %v705_v28, %v704_v24  ;;  %v512_v33 = vpop.f32.mrf.mxu0  ;;  %v656_v43 = vmax.f32 %v1486_v35, 0.0  ;;  %v1085_v48 = vpop.f32.mrf.mxu1  ;;  %v739_v59 = vsel %vm663_vm3, %v653_v34, 0.0 }
  0xef   : > { %670 = vst.msk [vmem:[%s1411_s26 + $0x30] sm:$0xff] %vm663_vm3, %v637_v29  ;;  %v707_v36 = vsel %vm663_vm3, %v637_v29, 0.0  ;;  %v640_v37 = vmax.f32 %v518_v30, 0.0  ;;  %v513_v38 = vadd.f32 %v1403_v41, %v512_v33  ;;  %v655_v51 = vmax.f32 %v1498_v44, 0.0 }
  0xf0   : > { %v708_v40 = vadd.f32 %v707_v36, %v706_v32  ;;  %v1061_v42 = vpop.f32.mrf.mxu0  ;;  %689 = vst.msk [vmem:[%s1411_s26 + $0xc8] sm:$0xff] %vm663_vm3, %v656_v43  ;;  %v1510_v53 = vadd.f32 %v1085_v48, %v1403_v41  ;;  %v602_v57 = vpop.f32.mrf.mxu1  ;;  %v745_v3 = vsel %vm663_vm3, %v656_v43, 0.0 }
  0xf1   : > { %673 = vst.msk [vmem:[%s1411_s26 + $0x48] sm:$0xff] %vm663_vm3, %v640_v37  ;;  %v639_v46 = vmax.f32 %v513_v38, 0.0  ;;  %v528_v47 = vadd.f32 %v1061_v42, %v1403_v41  ;;  %688 = vst.msk [vmem:[%s1411_s26 + $0xc0] sm:$0xff] %vm663_vm3, %v655_v51  ;;  %v1522_v63 = vadd.f32 %v1403_v41, %v602_v57  ;;  %v713_v0 = vsel %vm663_vm3, %v640_v37, 0.0 }
  0xf2   : > { %v710_v49 = vadd.f32 %v709_v45, %v708_v40  ;;  %v522_v50 = vpop.f32.mrf.mxu0  ;;  %v658_v62 = vmax.f32 %v1510_v53, 0.0  ;;  %v1088_v5 = vpop.f32.mrf.mxu1  ;;  %v743_v11 = vsel %vm663_vm3, %v655_v51, 0.0 }
  0xf3   : > { %672 = vst.msk [vmem:[%s1411_s26 + $0x40] sm:$0xff] %vm663_vm3, %v639_v46  ;;  %v711_v54 = vsel %vm663_vm3, %v639_v46, 0.0  ;;  %v642_v55 = vmax.f32 %v528_v47, 0.0  ;;  %v523_v56 = vadd.f32 %v1403_v41, %v522_v50  ;;  %v657_v8 = vmax.f32 %v1522_v63, 0.0 }
  0xf4   : > { %v712_v60 = vadd.f32 %v711_v54, %v710_v49  ;;  %v1064_v61 = vpop.f32.mrf.mxu0  ;;  %691 = vst.msk [vmem:[%s1411_s26 + $0xd8] sm:$0xff] %vm663_vm3, %v658_v62  ;;  %v1534_v9 = vadd.f32 %v1088_v5, %v1403_v41  ;;  %v612_v15 = vpop.f32.mrf.mxu1  ;;  %v749_v19 = vsel %vm663_vm3, %v658_v62, 0.0 }
  0xf5   : > { %675 = vst.msk [vmem:[%s1411_s26 + $0x58] sm:$0xff] %vm663_vm3, %v642_v55  ;;  %v641_v1 = vmax.f32 %v523_v56, 0.0  ;;  %v538_v4 = vadd.f32 %v1064_v61, %v1403_v41  ;;  %690 = vst.msk [vmem:[%s1411_s26 + $0xd0] sm:$0xff] %vm663_vm3, %v657_v8  ;;  %v1546_v21 = vadd.f32 %v1403_v41, %v612_v15  ;;  %v717_v22 = vsel %vm663_vm3, %v642_v55, 0.0 }
  0xf6   : > { %v714_v6 = vadd.f32 %v713_v0, %v712_v60  ;;  %v532_v7 = vpop.f32.mrf.mxu0  ;;  %v660_v20 = vmax.f32 %v1534_v9, 0.0  ;;  %v1091_v25 = vpop.f32.mrf.mxu1  ;;  %v747_v27 = vsel %vm663_vm3, %v657_v8, 0.0  ;;  %v770_v9 = vld [vmem:[%s1668_s4] sm:$0x1] }
  0xf7   : > { %674 = vst.msk [vmem:[%s1411_s26 + $0x50] sm:$0xff] %vm663_vm3, %v641_v1  ;;  %v715_v12 = vsel %vm663_vm3, %v641_v1, 0.0  ;;  %v644_v13 = vmax.f32 %v538_v4, 0.0  ;;  %v533_v14 = vadd.f32 %v1403_v41, %v532_v7  ;;  %v659_v30 = vmax.f32 %v1546_v21, 0.0 }
  0xf8   : > { %v716_v16 = vadd.f32 %v715_v12, %v714_v6  ;;  %v1067_v17 = vpop.f32.mrf.mxu0  ;;  %693 = vst.msk [vmem:[%s1411_s26 + $0xe8] sm:$0xff] %vm663_vm3, %v660_v20  ;;  %v628_v31 = vadd.f32 %v1091_v25, %v1403_v41  ;;  %v622_v37 = vpop.f32.mrf.mxu1  ;;  %v733_v12 = vsel %vm663_vm3, %v650_v58, 0.0  ;;  %v753_v35 = vsel %vm663_vm3, %v660_v20, 0.0 }
  0xf9   : > { %677 = vst.msk [vmem:[%s1411_s26 + $0x68] sm:$0xff] %vm663_vm3, %v644_v13  ;;  %v643_v23 = vmax.f32 %v533_v14, 0.0  ;;  %v548_v24 = vadd.f32 %v1067_v17, %v1403_v41  ;;  %692 = vst.msk [vmem:[%s1411_s26 + $0xe0] sm:$0xff] %vm663_vm3, %v659_v30  ;;  %v623_v42 = vadd.f32 %v1403_v41, %v622_v37  ;;  %v721_v45 = vsel %vm663_vm3, %v644_v13, 0.0 }
  0xfa   : > { %v718_v28 = vadd.f32 %v717_v22, %v716_v16  ;;  %v542_v29 = vpop.f32.mrf.mxu0  ;;  %v662_v40 = vmax.f32 %v628_v31, 0.0  ;;  %v735_v14 = vsel %vm663_vm3, %v651_v18, 0.0  ;;  %v737_v16 = vsel %vm663_vm3, %v652_v10, 0.0 }
  0xfb   : > { %676 = vst.msk [vmem:[%s1411_s26 + $0x60] sm:$0xff] %vm663_vm3, %v643_v23  ;;  %v719_v32 = vsel %vm663_vm3, %v643_v23, 0.0  ;;  %v646_v33 = vmax.f32 %v548_v24, 0.0  ;;  %v543_v36 = vadd.f32 %v1403_v41, %v542_v29  ;;  %v661_v50 = vmax.f32 %v623_v42, 0.0 }
  0xfc   : > { %v720_v38 = vadd.f32 %v719_v32, %v718_v28  ;;  %v1070_v39 = vpop.f32.mrf.mxu0  ;;  %695 = vst.msk [vmem:[%s1411_s26 + $0xf8] sm:$0xff] %vm663_vm3, %v662_v40  ;;  %v751_v44 = vsel %vm663_vm3, %v659_v30, 0.0  ;;  %v757_v8 = vsel %vm663_vm3, %v662_v40, 0.0 }
  0xfd   : > { %679 = vst.msk [vmem:[%s1411_s26 + $0x78] sm:$0xff] %vm663_vm3, %v646_v33  ;;  %v645_v46 = vmax.f32 %v543_v36, 0.0  ;;  %v558_v47 = vadd.f32 %v1070_v39, %v1403_v41  ;;  %694 = vst.msk [vmem:[%s1411_s26 + $0xf0] sm:$0xff] %vm663_vm3, %v661_v50  ;;  %v725_v60 = vsel %vm663_vm3, %v646_v33, 0.0  ;;  %v755_v63 = vsel %vm663_vm3, %v661_v50, 0.0 }
  0xfe   : > { %v722_v48 = vadd.f32 %v721_v45, %v720_v38  ;;  %v552_v49 = vpop.f32.mrf.mxu0 }
  0xff   : > { %678 = vst.msk [vmem:[%s1411_s26 + $0x70] sm:$0xff] %vm663_vm3, %v645_v46  ;;  %v723_v54 = vsel %vm663_vm3, %v645_v46, 0.0  ;;  %v648_v55 = vmax.f32 %v558_v47, 0.0  ;;  %v553_v56 = vadd.f32 %v1403_v41, %v552_v49  ;;  %v731_v41 = vsel %vm663_vm3, %v649_v2, 0.0 }
 0x100   : > { %v724_v57 = vadd.f32 %v723_v54, %v722_v48 }
 0x101   : > { %681 = vst.msk [vmem:[%s1411_s26 + $0x88] sm:$0xff] %vm663_vm3, %v648_v55  ;;  %v647_v61 = vmax.f32 %v553_v56, 0.0  ;;  %v729_v5 = vsel %vm663_vm3, %v648_v55, 0.0 }
 0x102   : > { %v726_v0 = vadd.f32 %v725_v60, %v724_v57 }
 0x103   : > { %680 = vst.msk [vmem:[%s1411_s26 + $0x80] sm:$0xff] %vm663_vm3, %v647_v61  ;;  %v727_v1 = vsel %vm663_vm3, %v647_v61, 0.0 }
 0x104   : > { %v728_v4 = vadd.f32 %v727_v1, %v726_v0 }
 0x106   : > { %v730_v6 = vadd.f32 %v729_v5, %v728_v4 }
 0x108   : > { %v732_v7 = vadd.f32 %v731_v41, %v730_v6 }
 0x10a   : > { %v734_v13 = vadd.f32 %v733_v12, %v732_v7 }
 0x10c   : > { %v736_v15 = vadd.f32 %v735_v14, %v734_v13 }
 0x10e   : > { %v738_v17 = vadd.f32 %v737_v16, %v736_v15 }
 0x110   : > { %v740_v2 = vadd.f32 %v739_v59, %v738_v17 }
 0x112   : > { %v742_v58 = vadd.f32 %v741_v52, %v740_v2 }
 0x114   : > { %v744_v18 = vadd.f32 %v743_v11, %v742_v58 }
 0x116   : > { %v746_v10 = vadd.f32 %v745_v3, %v744_v18 }
 0x118   : > { %v748_v34 = vadd.f32 %v747_v27, %v746_v10 }
 0x11a   : > { %v750_v26 = vadd.f32 %v749_v19, %v748_v34 }
 0x11c   : > { %v752_v51 = vadd.f32 %v751_v44, %v750_v26 }
 0x11e   : > { %v754_v43 = vadd.f32 %v753_v35, %v752_v51 }
 0x120   : > { %v756_v21 = vadd.f32 %v755_v63, %v754_v43 }
 0x122   : > { %v758_v22 = vadd.f32 %v757_v8, %v756_v21 }
 0x124   : > { %v759_v53 = vrot.slane %v758_v22, 4 }
 0x126   : > { %v760_v23 = vadd.f32 %v759_v53, %v758_v22 }
 0x128   : > { %v761_v62 = vrot.slane %v760_v23, 2 }
 0x12a   : > { %v762_v24 = vadd.f32 %v761_v62, %v760_v23 }
 0x12c   : > { %v763_v25 = vrot.slane %v762_v24, 1 }
 0x12e   : > { %v764_v28 = vadd.f32 %v763_v25, %v762_v24 }
 0x130   : > { %v765_v29 = vmul.f32 0.00390625, %v764_v28 }
 0x132   : > { %1101 = vmatmul.mubr.msk.f32.vlgmr.msra.gmra.mxu1 %vm663_vm3, %v765_v29 }
 0x1f2   : > { %v840_v20 = vpop.f32.mrf.mxu1 }
 0x1f3   : > { %v841_v30 = vadd.f32 %v840_v20, %v770_v9 }
 0x1f4   : > { %v1102_v31 = vpop.f32.mrf.mxu1 }
 0x1f5   : > { %845 = vst.msk [vmem:[%s251_s9] sm:$0x1] %vm844_vm4, %v841_v30 }
 0x1f6   : > { %1165 = shalt.err (!%p1162_p3)
}
 0x1f7   : > { %s1166_s20 = scalar_lea.hbm %s1629_s13, 16  ;;  %s1170_s18 = scalar_lea.hbm %s1670_s6, 32 }
 0x1f8   : > { %p1167_p4 = scmp.ne.s32.totalorder %s1629_s13, %s1166_s20  ;;  %p1171_p9 = scmp.lt.s32.totalorder %s1629_s13, %s1670_s6 }
 0x1f9   : > { %p1172_p10 = scmp.lt.s32.totalorder %s1170_s18, %s1166_s20 }
 0x1fa   : > { %p1168_p7 = pnand %p1167_p4, %p1290_p5 }
 0x1fb   : > { %p1173_p11 = por %p1172_p10, %p1171_p9 }
 0x1fc   : > { %p1169_p8 = pneg %p1168_p7 }
 0x1fe   : > { %p1174_p12 = pnand %p1173_p11, %p1169_p8 }
 0x200   : > { %1177 = shalt.err (!%p1174_p12)
}
 0x201   : > { %1111 = dma.vmem_to_hbm [thread:$0]  (%p1290_p5), %s868_s10, 16, %s1629_s13, %s852_s14  }
 0x202 PF: > { %p1117_p13 = scmp.ge.s32.totalorder %s1212_s24, 2  ;;  %s887_s9 = sand.u32 1, %s1200_s21  }
 0x203   : > { %s888_s11 = scalar_lea.sflag [#allocation3], %s887_s9 }
 0x204   : > { %p1114_p0 = pnand %p1117_p13, %p1294_p6 }
 0x206   : > { %p1115_p1 = pneg %p1114_p0 }
 0x208   : > { %1195 = dma.done.wait (%p1115_p1), %s888_s11, 16  }
 0x209   : > { %1197 = vsyncadd (%p1115_p1), %s888_s11, 4294967280  ;;  %p17_p2 = scmp.ge.s32.totalorder %s1277_s27, 4   ;;  %s1673_s21 = smov %s1204_s22 }
 0x20a   : > { %s1674_s22 = smov %s1208_s23  ;;  %s1675_s23 = smov %s1288_s30 }
 0x20b   : > { %s1676_s24 = smov %s1277_s27  ;;  %19 = sbr.rel (!%p17_p2) target bundleno = 3 (0x3), region = 87 }
 0x210   :  { %892 = vsyncpa [#allocation3], 1 }
 0x211   :  { %894 = vsyncpa [#allocation3 + $0x1], 1 }

</bundles_post_ra>
